<compile_context>
chip_gen: v5e
topology: v5e:2x2
jax: 0.10.0
libtpu: 0.0.40
codegen_flags: <defaults>
</compile_context>

<pallas_src>
import functools

import jax
import jax.numpy as jnp
from jax.experimental import pallas as pl
from jax.experimental.pallas import tpu as pltpu

N_SECTORS = 3          # nsec in the reference script
INTER_SECT = (0,)      # auxVar = [0] -> one "soft intersection" MLP on sector 0
H1, H2 = 20, 10        # MLP(1, 1): Linear(1,20) -> Linear(20,10) -> Linear(10,1)


def _round_up(x, m):
    return (x + m - 1) // m * m


def _pick_batch_tile(bsz, max_tile=4096):
    # Lane-dense tiles: multiples of 128, capped so VMEM stays tiny
    # (~150 B/column live set -> a 4096-wide tile is well under 1 MiB).
    return min(max_tile, _round_up(max(bsz, 1), 128))


def _demcurve_kernel(inter_sect, *refs):
    """refs = (p_ref, [w1, b1, w2, b2, w3t, b3, M,] out_ref); all (feature, batch)."""
    p_ref, out_ref = refs[0], refs[-1]
    p0 = p_ref[...]                                  # (nsec, TB)  f32
    p = p0

    if len(inter_sect) > 0:
        w1_ref, b1_ref, w2_ref, b2_ref, w3_ref, b3_ref, m_ref = refs[1:-1]
        for k, idx in enumerate(inter_sect):
            x = p0[idx:idx + 1, :]                   # (1, TB)   MLP input row
            # layer 1: outer product on the VPU      (H1,1)*(1,TB) -> (H1,TB)
            h1 = jnp.maximum(w1_ref[k] * x + b1_ref[k], 0.0)
            # layer 2: small dot, lane-dense N        (H2,H1)@(H1,TB) -> (H2,TB)
            h2 = jnp.maximum(
                jnp.dot(w2_ref[k], h1, preferred_element_type=jnp.float32)
                + b2_ref[k], 0.0)
            # layer 3: broadcast-mul + sublane reduce -> (1, TB)
            y = jnp.sum(w3_ref[k] * h2, axis=0, keepdims=True) + b3_ref[k]
            # p <- p + M[:, k] * y   (all inputs read from the ORIGINAL p0)
            p = p + m_ref[:, k:k + 1] * y            # (nsec,1)*(1,TB)

    # dCurve(p) = 1.42 / (exp(25 p - 10) + 1) = 1.42 * sigmoid(10 - 25 p)
    #           = 0.71 * (tanh(0.5 * (10 - 25 p)) + 1)   -- stable, EUP tanh
    z = 10.0 - 25.0 * p
    out_ref[...] = 0.71 * (jnp.tanh(0.5 * z) + 1.0)


def prepare_params(params, M):
    """One-time layout prep (done outside the per-call forward).

    Returns weights in (feature, batch)-friendly layout, all float32:
      w1  (n_int, H1, 1), b1 (n_int, H1, 1)
      w2  (n_int, H2, H1), b2 (n_int, H2, 1)
      w3t (n_int, H2, 1),  b3 (n_int, 1, 1)
      M   (nsec, n_int)
    """
    w1, b1, w2, b2, w3, b3 = params
    return (
        w1.astype(jnp.float32),                                # (n_int, H1, 1)
        b1.astype(jnp.float32)[:, :, None],                    # (n_int, H1, 1)
        w2.astype(jnp.float32),                                # (n_int, H2, H1)
        b2.astype(jnp.float32)[:, :, None],                    # (n_int, H2, 1)
        jnp.transpose(w3, (0, 2, 1)).astype(jnp.float32),      # (n_int, H2, 1)
        b3.astype(jnp.float32)[:, :, None],                    # (n_int, 1, 1)
        M.astype(jnp.float32),                                 # (nsec, n_int)
    )


def demcurve_forward(p, prepared, inter_sect=INTER_SECT, max_tile=4096):
    """p: (bsz, n_sectors, 1); returns (bsz, n_sectors, 1), matching DemCurve.forward."""
    bsz, nsec, _ = p.shape
    n_int = len(inter_sect)

    # glue: squeeze trailing dim, put batch on lanes, pad batch to the tile.
    p2 = jnp.transpose(p[:, :, 0].astype(jnp.float32))         # (nsec, bsz)
    tb = _pick_batch_tile(bsz, max_tile)
    padded = _round_up(bsz, tb)
    if padded != bsz:
        p2 = jnp.pad(p2, ((0, 0), (0, padded - bsz)))

    p_spec = pl.BlockSpec((nsec, tb), lambda i: (0, i))
    out_spec = pl.BlockSpec((nsec, tb), lambda i: (0, i))

    if n_int > 0:
        w1, b1, w2, b2, w3t, b3, m = prepared
        args = (p2, w1, b1, w2, b2, w3t, b3, m)
        # weights / M: full-array blocks, constant index_map -> VMEM-resident
        const3 = lambda i: (0, 0, 0)
        const2 = lambda i: (0, 0)
        in_specs = [
            p_spec,
            pl.BlockSpec(w1.shape, const3),
            pl.BlockSpec(b1.shape, const3),
            pl.BlockSpec(w2.shape, const3),
            pl.BlockSpec(b2.shape, const3),
            pl.BlockSpec(w3t.shape, const3),
            pl.BlockSpec(b3.shape, const3),
            pl.BlockSpec(m.shape, const2),
        ]
    else:
        args = (p2,)
        in_specs = [p_spec]

    kernel = functools.partial(_demcurve_kernel, tuple(inter_sect))
    out = pl.pallas_call(
        kernel,
        out_shape=jax.ShapeDtypeStruct((nsec, padded), jnp.float32),
        grid=(padded // tb,),
        in_specs=in_specs,
        out_specs=out_spec,
        compiler_params=pltpu.CompilerParams(
            dimension_semantics=("parallel",)),
    )(*args)

    # (nsec, padded) -> (bsz, nsec, 1)
    return jnp.transpose(out[:, :bsz])[:, :, None]


def _reference_forward(p, params, M, inter_sect=INTER_SECT):
    """Pure-JAX reference mirroring DemCurve.forward semantics (batch-first)."""
    w1, b1, w2, b2, w3, b3 = params
    p2 = p[:, :, 0]
    if len(inter_sect) > 0:
        cols = []
        for k, idx in enumerate(inter_sect):
            x = p2[:, idx:idx + 1]
            h1 = jnp.maximum(x @ w1[k].T + b1[k], 0.0)
            h2 = jnp.maximum(h1 @ w2[k].T + b2[k], 0.0)
            cols.append(h2 @ w3[k].T + b3[k])
        iv = jnp.concatenate(cols, axis=1)
        p2 = p2 + iv @ M.T
    return (1.42 / (jnp.exp(10.0 * (p2 / 0.4 - 1.0)) + 1.0))[:, :, None]


if __name__ == "__main__":
    key = jax.random.PRNGKey(0)
    ks = jax.random.split(key, 8)
    bsz = 2
    n_int = len(INTER_SECT)

    # deterministic synthetic parameters (shapes from MLP(1,1) in __init__)
    p = jax.random.uniform(ks[0], (bsz, N_SECTORS, 1), jnp.float32, 0.0, 0.8)
    w1 = 0.5 * jax.random.normal(ks[1], (n_int, H1, 1), jnp.float32)
    b1 = 0.1 * jax.random.normal(ks[2], (n_int, H1), jnp.float32)
    w2 = 0.5 * jax.random.normal(ks[3], (n_int, H2, H1), jnp.float32)
    b2 = 0.1 * jax.random.normal(ks[4], (n_int, H2), jnp.float32)
    w3 = 0.5 * jax.random.normal(ks[5], (n_int, 1, H2), jnp.float32)
    b3 = 0.1 * jax.random.normal(ks[6], (n_int, 1), jnp.float32)
    params = (w1, b1, w2, b2, w3, b3)

    # interMatrix(interSect, n_sectors): M[interSect[k], k] = 1
    M = jnp.zeros((N_SECTORS, n_int), jnp.float32)
    for k, idx in enumerate(INTER_SECT):
        M = M.at[idx, k].set(1.0)

    prepared = prepare_params(params, M)   # one-time layout prep

    out = demcurve_forward(p, prepared)
    out = jax.block_until_ready(out)

    ref = _reference_forward(p, params, M)
    assert out.shape == (bsz, N_SECTORS, 1)
    assert jnp.allclose(out, ref, atol=1e-4, rtol=1e-4), (
        jnp.max(jnp.abs(out - ref)))

    print("KERNEL_OK")
</pallas_src>

<mosaic_0001>
module attributes {stable_mosaic.version = 11 : i64} {
  func.func @_demcurve_kernel(%arg0: i32, %arg1: memref<3x128xf32, #tpu.memory_space<vmem>>, %arg2: memref<1x20x1xf32, #tpu.memory_space<vmem>>, %arg3: memref<1x20x1xf32, #tpu.memory_space<vmem>>, %arg4: memref<1x10x20xf32, #tpu.memory_space<vmem>>, %arg5: memref<1x10x1xf32, #tpu.memory_space<vmem>>, %arg6: memref<1x10x1xf32, #tpu.memory_space<vmem>>, %arg7: memref<1x1x1xf32, #tpu.memory_space<vmem>>, %arg8: memref<3x1xf32, #tpu.memory_space<vmem>>, %arg9: memref<3x128xf32, #tpu.memory_space<vmem>>) attributes {dimension_semantics = [#tpu.dimension_semantics<parallel>], iteration_bounds = array<i64: 1>, scalar_prefetch = 0 : i64, scratch_operands = 0 : i64, tpu.core_type = #tpu.core_type<tc>, window_params = [{transform_indices = @transform_0, window_bounds = array<i64: 3, 128>}, {pipeline_mode = #tpu.pipeline_mode<synchronous>, transform_indices = @transform_1, window_bounds = array<i64: 1, 20, 1>}, {pipeline_mode = #tpu.pipeline_mode<synchronous>, transform_indices = @transform_2, window_bounds = array<i64: 1, 20, 1>}, {pipeline_mode = #tpu.pipeline_mode<synchronous>, transform_indices = @transform_3, window_bounds = array<i64: 1, 10, 20>}, {pipeline_mode = #tpu.pipeline_mode<synchronous>, transform_indices = @transform_4, window_bounds = array<i64: 1, 10, 1>}, {pipeline_mode = #tpu.pipeline_mode<synchronous>, transform_indices = @transform_5, window_bounds = array<i64: 1, 10, 1>}, {pipeline_mode = #tpu.pipeline_mode<synchronous>, transform_indices = @transform_6, window_bounds = array<i64: 1, 1, 1>}, {pipeline_mode = #tpu.pipeline_mode<synchronous>, transform_indices = @transform_7, window_bounds = array<i64: 3, 1>}, {transform_indices = @transform_8, window_bounds = array<i64: 3, 128>}]} {
    %c0 = arith.constant 0 : index
    %c0_0 = arith.constant 0 : index
    %0 = vector.load %arg1[%c0, %c0_0] : memref<3x128xf32, #tpu.memory_space<vmem>>, vector<3x128xf32>
    %1 = vector.extract_strided_slice %0 {offsets = [0, 0], sizes = [1, 128], strides = [1, 1]} : vector<3x128xf32> to vector<1x128xf32>
    %c0_1 = arith.constant 0 : index
    %c0_2 = arith.constant 0 : index
    %c0_3 = arith.constant 0 : index
    %2 = vector.load %arg2[%c0_1, %c0_2, %c0_3] : memref<1x20x1xf32, #tpu.memory_space<vmem>>, vector<1x20x1xf32>
    %3 = vector.shape_cast %2 : vector<1x20x1xf32> to vector<20x1xf32>
    %4 = vector.broadcast %3 : vector<20x1xf32> to vector<20x128xf32>
    %5 = vector.broadcast %1 : vector<1x128xf32> to vector<20x128xf32>
    %6 = arith.mulf %4, %5 : vector<20x128xf32>
    %c0_4 = arith.constant 0 : index
    %c0_5 = arith.constant 0 : index
    %c0_6 = arith.constant 0 : index
    %7 = vector.load %arg3[%c0_4, %c0_5, %c0_6] : memref<1x20x1xf32, #tpu.memory_space<vmem>>, vector<1x20x1xf32>
    %8 = vector.shape_cast %7 : vector<1x20x1xf32> to vector<20x1xf32>
    %9 = vector.broadcast %8 : vector<20x1xf32> to vector<20x128xf32>
    %10 = arith.addf %6, %9 : vector<20x128xf32>
    %cst = arith.constant 0.000000e+00 : f32
    %11 = vector.broadcast %cst : f32 to vector<20x128xf32>
    %12 = arith.maximumf %10, %11 : vector<20x128xf32>
    %c0_7 = arith.constant 0 : index
    %c0_8 = arith.constant 0 : index
    %c0_9 = arith.constant 0 : index
    %13 = vector.load %arg4[%c0_7, %c0_8, %c0_9] : memref<1x10x20xf32, #tpu.memory_space<vmem>>, vector<1x10x20xf32>
    %14 = vector.shape_cast %13 : vector<1x10x20xf32> to vector<10x20xf32>
    %cst_10 = arith.constant dense<0.000000e+00> : vector<10x128xf32>
    %15 = tpu.matmul %14, %12, %cst_10 {dimension_numbers = #tpu.dot_dimension_numbers<[1], [0], [0], [1], [0, 0, 1, 1], [], []>} : vector<10x20xf32>, vector<20x128xf32>, vector<10x128xf32> -> vector<10x128xf32>
    %c0_11 = arith.constant 0 : index
    %c0_12 = arith.constant 0 : index
    %c0_13 = arith.constant 0 : index
    %16 = vector.load %arg5[%c0_11, %c0_12, %c0_13] : memref<1x10x1xf32, #tpu.memory_space<vmem>>, vector<1x10x1xf32>
    %17 = vector.shape_cast %16 : vector<1x10x1xf32> to vector<10x1xf32>
    %18 = vector.broadcast %17 : vector<10x1xf32> to vector<10x128xf32>
    %19 = arith.addf %15, %18 : vector<10x128xf32>
    %cst_14 = arith.constant 0.000000e+00 : f32
    %20 = vector.broadcast %cst_14 : f32 to vector<10x128xf32>
    %21 = arith.maximumf %19, %20 : vector<10x128xf32>
    %c0_15 = arith.constant 0 : index
    %c0_16 = arith.constant 0 : index
    %c0_17 = arith.constant 0 : index
    %22 = vector.load %arg6[%c0_15, %c0_16, %c0_17] : memref<1x10x1xf32, #tpu.memory_space<vmem>>, vector<1x10x1xf32>
    %23 = vector.shape_cast %22 : vector<1x10x1xf32> to vector<10x1xf32>
    %24 = vector.broadcast %23 : vector<10x1xf32> to vector<10x128xf32>
    %25 = arith.mulf %24, %21 : vector<10x128xf32>
    %cst_18 = arith.constant dense<0.000000e+00> : vector<128xf32>
    %26 = vector.multi_reduction <add>, %25, %cst_18 [0] : vector<10x128xf32> to vector<128xf32>
    %27 = vector.shape_cast %26 : vector<128xf32> to vector<1x128xf32>
    %c0_19 = arith.constant 0 : index
    %c0_20 = arith.constant 0 : index
    %c0_21 = arith.constant 0 : index
    %28 = vector.load %arg7[%c0_19, %c0_20, %c0_21] : memref<1x1x1xf32, #tpu.memory_space<vmem>>, vector<1x1x1xf32>
    %29 = vector.shape_cast %28 : vector<1x1x1xf32> to vector<1x1xf32>
    %30 = vector.broadcast %29 : vector<1x1xf32> to vector<1x128xf32>
    %31 = arith.addf %27, %30 : vector<1x128xf32>
    %c0_22 = arith.constant 0 : index
    %c0_23 = arith.constant 0 : index
    %32 = vector.load %arg8[%c0_22, %c0_23] : memref<3x1xf32, #tpu.memory_space<vmem>>, vector<3x1xf32>
    %33 = vector.broadcast %32 : vector<3x1xf32> to vector<3x128xf32>
    %34 = vector.broadcast %31 : vector<1x128xf32> to vector<3x128xf32>
    %35 = arith.mulf %33, %34 : vector<3x128xf32>
    %36 = arith.addf %0, %35 : vector<3x128xf32>
    %cst_24 = arith.constant 2.500000e+01 : f32
    %37 = vector.broadcast %cst_24 : f32 to vector<3x128xf32>
    %38 = arith.mulf %37, %36 : vector<3x128xf32>
    %cst_25 = arith.constant 1.000000e+01 : f32
    %39 = vector.broadcast %cst_25 : f32 to vector<3x128xf32>
    %40 = arith.subf %39, %38 : vector<3x128xf32>
    %cst_26 = arith.constant 5.000000e-01 : f32
    %41 = vector.broadcast %cst_26 : f32 to vector<3x128xf32>
    %42 = arith.mulf %41, %40 : vector<3x128xf32>
    %43 = math.tanh %42 : vector<3x128xf32>
    %cst_27 = arith.constant 1.000000e+00 : f32
    %44 = vector.broadcast %cst_27 : f32 to vector<3x128xf32>
    %45 = arith.addf %43, %44 : vector<3x128xf32>
    %cst_28 = arith.constant 0.709999978 : f32
    %46 = vector.broadcast %cst_28 : f32 to vector<3x128xf32>
    %47 = arith.mulf %46, %45 : vector<3x128xf32>
    %c0_29 = arith.constant 0 : index
    %c0_30 = arith.constant 0 : index
    %48 = vector.load %arg9[%c0_29, %c0_30] : memref<3x128xf32, #tpu.memory_space<vmem>>, vector<3x128xf32>
    tpu.vector_store %arg9[%c0_29, %c0_30], %47 {strides = array<i32>} : memref<3x128xf32, #tpu.memory_space<vmem>>, vector<3x128xf32>,
    return
  }
  func.func @transform_0(%arg0: i32) -> (i32, i32) {
    %c0_i32 = arith.constant 0 : i32
    %c0_i32_0 = arith.constant 0 : i32
    return %c0_i32, %arg0 : i32, i32
  }
  func.func @transform_1(%arg0: i32) -> (i32, i32, i32) {
    %c0_i32 = arith.constant 0 : i32
    %c0_i32_0 = arith.constant 0 : i32
    %c0_i32_1 = arith.constant 0 : i32
    %c0_i32_2 = arith.constant 0 : i32
    return %c0_i32, %c0_i32_0, %c0_i32_1 : i32, i32, i32
  }
  func.func @transform_2(%arg0: i32) -> (i32, i32, i32) {
    %c0_i32 = arith.constant 0 : i32
    %c0_i32_0 = arith.constant 0 : i32
    %c0_i32_1 = arith.constant 0 : i32
    %c0_i32_2 = arith.constant 0 : i32
    return %c0_i32, %c0_i32_0, %c0_i32_1 : i32, i32, i32
  }
  func.func @transform_3(%arg0: i32) -> (i32, i32, i32) {
    %c0_i32 = arith.constant 0 : i32
    %c0_i32_0 = arith.constant 0 : i32
    %c0_i32_1 = arith.constant 0 : i32
    %c0_i32_2 = arith.constant 0 : i32
    return %c0_i32, %c0_i32_0, %c0_i32_1 : i32, i32, i32
  }
  func.func @transform_4(%arg0: i32) -> (i32, i32, i32) {
    %c0_i32 = arith.constant 0 : i32
    %c0_i32_0 = arith.constant 0 : i32
    %c0_i32_1 = arith.constant 0 : i32
    %c0_i32_2 = arith.constant 0 : i32
    return %c0_i32, %c0_i32_0, %c0_i32_1 : i32, i32, i32
  }
  func.func @transform_5(%arg0: i32) -> (i32, i32, i32) {
    %c0_i32 = arith.constant 0 : i32
    %c0_i32_0 = arith.constant 0 : i32
    %c0_i32_1 = arith.constant 0 : i32
    %c0_i32_2 = arith.constant 0 : i32
    return %c0_i32, %c0_i32_0, %c0_i32_1 : i32, i32, i32
  }
  func.func @transform_6(%arg0: i32) -> (i32, i32, i32) {
    %c0_i32 = arith.constant 0 : i32
    %c0_i32_0 = arith.constant 0 : i32
    %c0_i32_1 = arith.constant 0 : i32
    %c0_i32_2 = arith.constant 0 : i32
    return %c0_i32, %c0_i32_0, %c0_i32_1 : i32, i32, i32
  }
  func.func @transform_7(%arg0: i32) -> (i32, i32) {
    %c0_i32 = arith.constant 0 : i32
    %c0_i32_0 = arith.constant 0 : i32
    %c0_i32_1 = arith.constant 0 : i32
    return %c0_i32, %c0_i32_0 : i32, i32
  }
  func.func @transform_8(%arg0: i32) -> (i32, i32) {
    %c0_i32 = arith.constant 0 : i32
    %c0_i32_0 = arith.constant 0 : i32
    return %c0_i32, %arg0 : i32, i32
  }
}

</mosaic_0001>

<bundles_post_ra>
// kernel: tpu_custom_call.1
= control target key start
LH: loop header
LB: loop body
LE: loop exit
PB: predicated region body
PF: predicated region fallthrough
CT: control target
= control target key end

     0   :  { %s325_s0 = inlined_call_operand.vmem [shape: f32[3,128], index: 0, kind: input, shape index: {}]   ;;  %s326_s1 = inlined_call_operand.vmem [shape: f32[1,20,1], index: 1, kind: input, shape index: {}]   ;;  %s327_s2 = inlined_call_operand.vmem [shape: f32[1,20,1], index: 2, kind: input, shape index: {}]   ;;  %s328_s3 = inlined_call_operand.vmem [shape: f32[1,10,20], index: 3, kind: input, shape index: {}]   ;;  %s329_s4 = inlined_call_operand.vmem [shape: f32[1,10,1], index: 4, kind: input, shape index: {}]   ;;  %s330_s5 = inlined_call_operand.vmem [shape: f32[1,10,1], index: 5, kind: input, shape index: {}]   ;;  %s331_s6 = inlined_call_operand.<no memory space> [shape: f32[1,1,1], index: 6, kind: input, shape index: {}]   ;;  %s332_s7 = inlined_call_operand.vmem [shape: f32[3,1], index: 7, kind: input, shape index: {}]   ;;  %s333_s8 = inlined_call_operand.hbm [shape: f32[3,128], index: 8, kind: output, shape index: {}]  }
   0x1   :  { %v13_v0 = vstv %s331_s6 }
   0x2   :  { %14 = vst [vmem:[#allocation2] sm:$0x1] %v13_v0 }
   0x3   :  { %v57_v1 = vld [vmem:[%s327_s2 + $0x10] sm:$0xf]  ;;  %v230_v3 = vmov 0   ;;  %v56_v4 = vld [vmem:[%s327_s2 + $0x8] sm:$0xff] }
   0x4   :  { %v35_v2 = vld [vmem:[%s326_s1 + $0x10] sm:$0xf]  ;;  %200 = vset.pattern.permute.xlu1 %v230_v3  ;;  %199 = vset.pattern.permute.xlu0 %v230_v3 }
   0x5   :  { %70 = vperm.xlu1 %200, %v57_v1   ;;  %48 = vperm.xlu0 %199, %v35_v2  }
   0x6   :  { %201 = vset.pattern.permute.xlu2 %v230_v3 }
   0x7   :  { %65 = vperm.xlu2 %201, %v56_v4  }
   0x8   :  { %15 = vsyncpa [#allocation4], 0  ;;  %v34_v5 = vld [vmem:[%s326_s1 + $0x8] sm:$0xff]  ;;  %v33_v6 = vld [vmem:[%s326_s1] sm:$0xff]  ;;  %vm100_vm0 = vcmask 1043456   ;;  %vm93_vm1 = vcmask 162816  }
   0x9   :  { %v55_v7 = vld [vmem:[%s327_s2] sm:$0xff]  ;;  %v82_v8 = vld [vmem:[%s329_s4 + $0x8] sm:$0x3]  ;;  %vm143_vm2 = vcmask 1041408   ;;  %s182_s9 = sshll.u32 %s333_s8, 4  ;;  %s183_s9 = int_to_ptr.hbm [resolvable:$true] %s182_s9 }
   0xa   :  { %v81_v9 = vld [vmem:[%s329_s4] sm:$0xff]  ;;  %v130_v10 = vld [vmem:[%s330_s5 + $0x8] sm:$0x3] }
   0xb   :  { %v129_v11 = vld [vmem:[%s330_s5] sm:$0xff]  ;;  %v80_v32 = vld [vmem:[%s328_s3 + $0x8] sm:$0x3] }
   0xc   :  { %v152_v12 = vld [vmem:[#allocation2] sm:$0x1] }
   0xd   :  { %43 = vperm.xlu0 %199, %v34_v5   ;;  %38 = vperm.xlu1 %200, %v33_v6   ;;  %v160_v13 = vld [vmem:[%s332_s7] sm:$0x7] }
   0xe   :  { %v32_v14 = vld [vmem:[%s325_s0] sm:$0x7] }
   0xf   :  { %60 = vperm.xlu2 %201, %v55_v7   ;;  %v51_v15 = vperm.slane %v32_v14, 0  ;;  %v79_v31 = vld [vmem:[%s328_s3] sm:$0xff]  ;;  %s231_s3 = smov [#allocation3]  }
  0x10   :  { %s180_s28 = sshll.u32 %s231_s3, 4  ;;  %s181_s28 = int_to_ptr.vmem [resolvable:$true] %s180_s28 }
  0x15   :  { %90 = vperm.xlu0 %199, %v82_v8   ;;  %85 = vperm.xlu1 %200, %v81_v9  }
  0x17   :  { %138 = vperm.xlu2 %201, %v130_v10  }
  0x1d   :  { %133 = vperm.xlu0 %199, %v129_v11   ;;  %155 = vperm.xlu1 %200, %v152_v12  }
  0x1f   :  { %163 = vperm.xlu2 %201, %v160_v13  }
  0x61   :  { %v66_v16 = vpop.permute.xlu2 %65 }
  0x69   :  { %v61_v26 = vpop.permute.xlu2 %60 }
  0x71   :  { %v139_v41 = vpop.permute.xlu2 %138 }
  0x77   :  { %v71_v17 = vpop.permute.xlu1 %70  ;;  %v49_v18 = vpop.permute.xlu0 %48 }
  0x78   :  { %v54_v19 = vmul.f32 %v51_v15, %v49_v18 }
  0x79   :  { %v164_v56 = vpop.permute.xlu2 %163 }
  0x7a   :  { %v75_v20 = vadd.f32 %v71_v17, %v54_v19 }
  0x7c   :  { %v78_v21 = vmax.f32 %v75_v20, 0.0 }
  0x7e   :  { %191 = vmatpush.msk.msra.mxu0 %vm100_vm0, %v78_v21  ;;  %194 = vmatpush.msk.msra.mxu1 %vm100_vm0, %v78_v21 }
  0x7f   :  { %v44_v22 = vpop.permute.xlu0 %43  ;;  %v39_v23 = vpop.permute.xlu1 %38 }
  0x80   :  { %v53_v24 = vmul.f32 %v51_v15, %v44_v22  ;;  %v52_v25 = vmul.f32 %v51_v15, %v39_v23 }
  0x82   :  { %v74_v27 = vadd.f32 %v66_v16, %v53_v24  ;;  %v73_v28 = vadd.f32 %v61_v26, %v52_v25 }
  0x84   :  { %v77_v29 = vmax.f32 %v74_v27, 0.0  ;;  %v76_v30 = vmax.f32 %v73_v28, 0.0 }
  0x86   :  { %118 = vmatpush.msra.mxu0 %v77_v29  ;;  %195 = vmatpush.msra.mxu1 %v77_v29 }
  0x87   :  { %v91_v33 = vpop.permute.xlu0 %90  ;;  %v86_v34 = vpop.permute.xlu1 %85 }
  0x88   :  { %119 = vmatpush.msra.mxu0 %v76_v30  ;;  %196 = vmatpush.msra.mxu1 %v76_v30 }
  0x89   :  { %192 = vmatmul.msk.f32.vlgmr.msra.gmra.mxu0 %vm93_vm1, %v79_v31  ;;  %193 = vmatmul.msk.f32.vlgmr.msra.gmra.mxu1 %vm93_vm1, %v80_v32 }
  0x8f   :  { %v134_v42 = vpop.permute.xlu0 %133  ;;  %v156_v51 = vpop.permute.xlu1 %155 }
  0x90   :  { %v158_v53 = vperm.slane %v156_v51, 0 }
 0x106   :  { %v121_v35 = vpop.f32.mrf.mxu0  ;;  %v124_v36 = vpop.f32.mrf.mxu1 }
 0x107   :  { %v122_v37 = vadd.f32 %v121_v35, %v86_v34  ;;  %v125_v38 = vadd.f32 %v124_v36, %v91_v33 }
 0x109   :  { %v127_v39 = vmax.f32 %v122_v37, 0.0  ;;  %v128_v40 = vmax.f32 %v125_v38, 0.0 }
 0x10b   :  { %v141_v43 = vmul.f32 %v134_v42, %v127_v39  ;;  %v142_v44 = vmul.f32 %v139_v41, %v128_v40 }
 0x10d   :  { %v144_v45 = vsel %vm143_vm2, %v142_v44, 0.0 }
 0x10e   :  { %v145_v46 = vadd.f32 %v144_v45, %v141_v43 }
 0x110   :  { %v146_v47 = vrot.slane %v145_v46, 4 }
 0x112   :  { %v147_v48 = vadd.f32 %v146_v47, %v145_v46 }
 0x114   :  { %v148_v49 = vrot.slane %v147_v48, 2 }
 0x116   :  { %v149_v50 = vadd.f32 %v148_v49, %v147_v48 }
 0x118   :  { %v150_v52 = vrot.slane %v149_v50, 1 }
 0x11a   :  { %v151_v54 = vadd.f32 %v150_v52, %v149_v50 }
 0x11c   :  { %v159_v55 = vadd.f32 %v158_v53, %v151_v54 }
 0x11e   :  { %v166_v57 = vmul.f32 %v164_v56, %v159_v55 }
 0x120   :  { %v167_v58 = vadd.f32 %v166_v57, %v32_v14 }
 0x122   :  { %v168_v59 = vmul.f32 25.0, %v167_v58 }
 0x124   :  { %v169_v60 = vsub.f32 10.0, %v168_v59 }
 0x126   :  { %v170_v61 = vmul.f32 0.5, %v169_v60 }
 0x128   :  { %202 = vtanh.f32 %v170_v61 }
 0x12e   :  { %v203_v62 = vpop.eup %202 }
 0x12f   :  { %v172_v63 = vadd.f32 1.0, %v203_v62 }
 0x131   :  { %v173_v0 = vmul.f32 0.71, %v172_v63 }
 0x133   :  { %174 = vst [vmem:[#allocation3] sm:$0x7] %v173_v0 }
 0x134   :  { %185 = dma.vmem_to_hbm [thread:$0]  %s181_s28, 64, %s183_s9, [#allocation4]  }
 0x135   :  { %228 = dma.done.wait [#allocation4], 64  }
 0x136   :  { %229 = vsyncadd [#allocation4], 4294967232 }
 0x137   :  { %190 = vsyncpa [#allocation4], 1 }

</bundles_post_ra>
